<compile_context>
chip_gen: v7x
topology: tpu7x:2x2x1
jax: 0.10.0
libtpu: 0.0.40
codegen_flags: <defaults>
</compile_context>

<pallas_src>
import jax
import jax.numpy as jnp
from jax.experimental import pallas as pl
from jax.experimental.pallas import tpu as pltpu

ACTION_DIM = 3
HIDDEN = 32
PAD = 128                                # lane-dense width for hidden / output tiles
TB_TARGET = 1024                         # batch tile target (sweep 512/1024/2048)
VMEM_DATA_BUDGET = 20 * 1024 * 1024      # budget for per-step data buffers (tb derivation)
VMEM_LIMIT_BYTES = 32 * 1024 * 1024      # scoped VMEM limit: safe on v5e/v6e/v7x


def _round_up(x, m):
    return ((x + m - 1) // m) * m


def _round_down(x, m):
    return (x // m) * m


def _policy_mu_kernel(x_ref, w1_ref, b1_ref, w2_ref, b2_ref, mu_ref):
    # First matmul: bf16 x bf16 on the MXU, f32 accumulation.  (x cast here,
    # in VMEM, so no extra HBM pass; W1 already stored bf16.)
    x = x_ref[...].astype(jnp.bfloat16)
    h = jnp.dot(x, w1_ref[...], preferred_element_type=jnp.float32) + b1_ref[...]
    h = jnp.maximum(h, 0.0)                      # ReLU epilogue in f32
    # Second (tiny) matmul: bf16 x bf16 -> f32 accum; padded hidden lanes /
    # output lanes are zero, so they contribute / produce zeros.
    mu = jnp.dot(h.astype(jnp.bfloat16), w2_ref[...],
                 preferred_element_type=jnp.float32) + b2_ref[...]
    # N is padded to 128 -> full-lane, unmasked vst.
    mu_ref[...] = mu.astype(mu_ref.dtype)


def prepare_params(w1, b1, w2, b2):
    """One-time padding / casting of the MLP head parameters (hoisted out of
    the per-call path).  Call once at setup and reuse the result."""
    D = w1.shape[0]
    w1_p = jnp.zeros((D, PAD), jnp.bfloat16).at[:, :HIDDEN].set(
        w1.astype(jnp.bfloat16))
    b1_p = jnp.zeros((1, PAD), jnp.float32).at[0, :HIDDEN].set(
        b1.astype(jnp.float32))
    w2_p = jnp.zeros((PAD, PAD), jnp.bfloat16).at[:HIDDEN, :ACTION_DIM].set(
        w2.astype(jnp.bfloat16))
    b2_p = jnp.zeros((1, PAD), jnp.float32).at[0, :ACTION_DIM].set(
        b2.astype(jnp.float32))
    return w1_p, b1_p, w2_p, b2_p


def _pick_batch_tile(B, D, x_itemsize):
    """Batch tile: multiple of 8, as large as possible within the VMEM data
    budget, capped so batches >= 16 rows give >= 2 grid steps (v7x megacore)."""
    b8 = _round_up(max(B, 1), 8)
    tb = min(TB_TARGET, b8)
    if b8 >= 16:
        tb = min(tb, _round_up(pl.cdiv(b8, 2), 8))
    # Per-row VMEM bytes: x double-buffered (input dtype) + in-kernel bf16 copy
    # + double-buffered f32 output tile.
    per_row = 2 * x_itemsize * D + 2 * D + 2 * 4 * PAD
    cap = max(8, _round_down(VMEM_DATA_BUDGET // per_row, 8))
    # TODO(synk): for very large D (cap pinned at 8), add a K grid axis over D
    # ("arbitrary", last) with an f32 accumulator scratch instead of shrinking tb.
    return max(8, _round_down(min(tb, cap), 8))


def policy_with_log_std(x_nchw, prepared_params, log_std):
    """Returns (mu, log_std_expanded), both [B, ACTION_DIM] float32."""
    w1_p, b1_p, w2_p, b2_p = prepared_params
    B = x_nchw.shape[0]
    x_flat = x_nchw.reshape(B, -1)        # reshape only; no dtype copy of x
    D = x_flat.shape[1]

    tb = _pick_batch_tile(B, D, x_flat.dtype.itemsize)
    grid_b = pl.cdiv(B, tb)
    b_out = grid_b * tb                   # whole output blocks (no masked stores)

    mu_padded = pl.pallas_call(
        _policy_mu_kernel,
        out_shape=jax.ShapeDtypeStruct((b_out, PAD), jnp.float32),
        grid=(grid_b,),
        in_specs=[
            # x gridded over batch; ragged last block is fine (row-independent,
            # garbage rows never reach the sliced result).
            pl.BlockSpec((tb, D), lambda i: (i, 0)),
            pl.BlockSpec((D, PAD), lambda i: (0, 0)),    # W1: VMEM-resident (bf16)
            pl.BlockSpec((1, PAD), lambda i: (0, 0)),    # b1
            pl.BlockSpec((PAD, PAD), lambda i: (0, 0)),  # W2 (bf16)
            pl.BlockSpec((1, PAD), lambda i: (0, 0)),    # b2
        ],
        out_specs=pl.BlockSpec((tb, PAD), lambda i: (i, 0)),
        compiler_params=pltpu.CompilerParams(
            dimension_semantics=("parallel",),
            vmem_limit_bytes=VMEM_LIMIT_BYTES,
        ),
    )(x_flat, w1_p, b1_p, w2_p, b2_p)

    mu = mu_padded[:B, :ACTION_DIM]
    # log_std is independent of x: broadcast in plain JAX (fuses, ~free).
    ls = jnp.broadcast_to(log_std[None, :].astype(jnp.float32), (B, ACTION_DIM))
    return mu, ls


def init_params(key, in_features):
    """Deterministic synthetic parameters for the 'pretrained' MLP head."""
    k1, k2, k3, k4 = jax.random.split(key, 4)
    scale1 = 1.0 / jnp.sqrt(in_features)
    scale2 = 1.0 / jnp.sqrt(HIDDEN)
    w1 = jax.random.uniform(k1, (in_features, HIDDEN), jnp.float32,
                            -scale1, scale1)
    b1 = jax.random.uniform(k2, (HIDDEN,), jnp.float32, -scale1, scale1)
    w2 = jax.random.uniform(k3, (HIDDEN, ACTION_DIM), jnp.float32,
                            -scale2, scale2)
    b2 = jax.random.uniform(k4, (ACTION_DIM,), jnp.float32, -scale2, scale2)
    # nn.Parameter(torch.ones(action_dim) * -2.0)
    log_std = jnp.full((ACTION_DIM,), -2.0, dtype=jnp.float32)
    return w1, b1, w2, b2, log_std


if __name__ == "__main__":
    key = jax.random.PRNGKey(0)
    kx, kp = jax.random.split(key)

    B, C, H, W = 2, 4, 16, 16
    x = jax.random.normal(kx, (B, C, H, W), dtype=jnp.float32)

    w1, b1, w2, b2, log_std = init_params(kp, C * H * W)
    prepared = prepare_params(w1, b1, w2, b2)        # one-time, hoisted

    mu, ls = policy_with_log_std(x, prepared, log_std)
    mu, ls = jax.block_until_ready((mu, ls))

    # Reference in plain JAX, mirroring the kernel's bf16-input / f32-accum
    # matmuls (the kernel runs both matmuls with bf16 operands on the MXU).
    x_flat = x.reshape(B, -1)
    h_ref = jnp.dot(x_flat.astype(jnp.bfloat16), w1.astype(jnp.bfloat16),
                    preferred_element_type=jnp.float32) + b1
    h_ref = jnp.maximum(h_ref, 0.0)
    mu_ref = jnp.dot(h_ref.astype(jnp.bfloat16), w2.astype(jnp.bfloat16),
                     preferred_element_type=jnp.float32) + b2
    ls_ref = jnp.broadcast_to(log_std[None, :], mu_ref.shape)

    assert mu.shape == (B, ACTION_DIM) and ls.shape == (B, ACTION_DIM)
    assert jnp.allclose(mu, mu_ref, atol=2e-3, rtol=2e-3), "mu mismatch"
    assert jnp.allclose(ls, ls_ref, atol=1e-6), "log_std mismatch"

    print("KERNEL_OK")
</pallas_src>

<mosaic_0001>
module attributes {stable_mosaic.version = 11 : i64} {
  func.func @_policy_mu_kernel(%arg0: i32, %arg1: memref<8x1024xf32, #tpu.memory_space<vmem>>, %arg2: memref<1024x128xbf16, #tpu.memory_space<vmem>>, %arg3: memref<1x128xf32, #tpu.memory_space<vmem>>, %arg4: memref<128x128xbf16, #tpu.memory_space<vmem>>, %arg5: memref<1x128xf32, #tpu.memory_space<vmem>>, %arg6: memref<8x128xf32, #tpu.memory_space<vmem>>) attributes {dimension_semantics = [#tpu.dimension_semantics<parallel>], iteration_bounds = array<i64: 1>, scalar_prefetch = 0 : i64, scratch_operands = 0 : i64, tpu.core_type = #tpu.core_type<tc>, window_params = [{transform_indices = @transform_0, window_bounds = array<i64: 8, 1024>}, {pipeline_mode = #tpu.pipeline_mode<synchronous>, transform_indices = @transform_1, window_bounds = array<i64: 1024, 128>}, {pipeline_mode = #tpu.pipeline_mode<synchronous>, transform_indices = @transform_2, window_bounds = array<i64: 1, 128>}, {pipeline_mode = #tpu.pipeline_mode<synchronous>, transform_indices = @transform_3, window_bounds = array<i64: 128, 128>}, {pipeline_mode = #tpu.pipeline_mode<synchronous>, transform_indices = @transform_4, window_bounds = array<i64: 1, 128>}, {transform_indices = @transform_5, window_bounds = array<i64: 8, 128>}]} {
    %c0 = arith.constant 0 : index
    %c0_0 = arith.constant 0 : index
    %0 = vector.load %arg1[%c0, %c0_0] : memref<8x1024xf32, #tpu.memory_space<vmem>>, vector<8x1024xf32>
    %1 = arith.truncf %0 : vector<8x1024xf32> to vector<8x1024xbf16>
    %c0_1 = arith.constant 0 : index
    %c0_2 = arith.constant 0 : index
    %2 = vector.load %arg2[%c0_1, %c0_2] : memref<1024x128xbf16, #tpu.memory_space<vmem>>, vector<1024x128xbf16>
    %cst = arith.constant dense<0.000000e+00> : vector<8x128xf32>
    %3 = tpu.matmul %1, %2, %cst {dimension_numbers = #tpu.dot_dimension_numbers<[1], [0], [0], [1], [0, 0, 1, 1], [], []>} : vector<8x1024xbf16>, vector<1024x128xbf16>, vector<8x128xf32> -> vector<8x128xf32>
    %c0_3 = arith.constant 0 : index
    %c0_4 = arith.constant 0 : index
    %4 = vector.load %arg3[%c0_3, %c0_4] : memref<1x128xf32, #tpu.memory_space<vmem>>, vector<1x128xf32>
    %5 = vector.broadcast %4 : vector<1x128xf32> to vector<8x128xf32>
    %6 = arith.addf %3, %5 : vector<8x128xf32>
    %cst_5 = arith.constant 0.000000e+00 : f32
    %7 = vector.broadcast %cst_5 : f32 to vector<8x128xf32>
    %8 = arith.maximumf %6, %7 : vector<8x128xf32>
    %9 = arith.truncf %8 : vector<8x128xf32> to vector<8x128xbf16>
    %c0_6 = arith.constant 0 : index
    %c0_7 = arith.constant 0 : index
    %10 = vector.load %arg4[%c0_6, %c0_7] : memref<128x128xbf16, #tpu.memory_space<vmem>>, vector<128x128xbf16>
    %cst_8 = arith.constant dense<0.000000e+00> : vector<8x128xf32>
    %11 = tpu.matmul %9, %10, %cst_8 {dimension_numbers = #tpu.dot_dimension_numbers<[1], [0], [0], [1], [0, 0, 1, 1], [], []>} : vector<8x128xbf16>, vector<128x128xbf16>, vector<8x128xf32> -> vector<8x128xf32>
    %c0_9 = arith.constant 0 : index
    %c0_10 = arith.constant 0 : index
    %12 = vector.load %arg5[%c0_9, %c0_10] : memref<1x128xf32, #tpu.memory_space<vmem>>, vector<1x128xf32>
    %13 = vector.broadcast %12 : vector<1x128xf32> to vector<8x128xf32>
    %14 = arith.addf %11, %13 : vector<8x128xf32>
    %c0_11 = arith.constant 0 : index
    %c0_12 = arith.constant 0 : index
    %15 = vector.load %arg6[%c0_11, %c0_12] : memref<8x128xf32, #tpu.memory_space<vmem>>, vector<8x128xf32>
    tpu.vector_store %arg6[%c0_11, %c0_12], %14 {strides = array<i32>} : memref<8x128xf32, #tpu.memory_space<vmem>>, vector<8x128xf32>,
    return
  }
  func.func @transform_0(%arg0: i32) -> (i32, i32) {
    %c0_i32 = arith.constant 0 : i32
    %c0_i32_0 = arith.constant 0 : i32
    return %arg0, %c0_i32 : i32, i32
  }
  func.func @transform_1(%arg0: i32) -> (i32, i32) {
    %c0_i32 = arith.constant 0 : i32
    %c0_i32_0 = arith.constant 0 : i32
    %c0_i32_1 = arith.constant 0 : i32
    return %c0_i32, %c0_i32_0 : i32, i32
  }
  func.func @transform_2(%arg0: i32) -> (i32, i32) {
    %c0_i32 = arith.constant 0 : i32
    %c0_i32_0 = arith.constant 0 : i32
    %c0_i32_1 = arith.constant 0 : i32
    return %c0_i32, %c0_i32_0 : i32, i32
  }
  func.func @transform_3(%arg0: i32) -> (i32, i32) {
    %c0_i32 = arith.constant 0 : i32
    %c0_i32_0 = arith.constant 0 : i32
    %c0_i32_1 = arith.constant 0 : i32
    return %c0_i32, %c0_i32_0 : i32, i32
  }
  func.func @transform_4(%arg0: i32) -> (i32, i32) {
    %c0_i32 = arith.constant 0 : i32
    %c0_i32_0 = arith.constant 0 : i32
    %c0_i32_1 = arith.constant 0 : i32
    return %c0_i32, %c0_i32_0 : i32, i32
  }
  func.func @transform_5(%arg0: i32) -> (i32, i32) {
    %c0_i32 = arith.constant 0 : i32
    %c0_i32_0 = arith.constant 0 : i32
    return %arg0, %c0_i32 : i32, i32
  }
}

</mosaic_0001>

<bundles_post_ra>
// kernel: tpu_custom_call.1
= control target key start
LH: loop header
LB: loop body
LE: loop exit
PB: predicated region body
PF: predicated region fallthrough
CT: control target
= control target key end

     0   :  { %10 = vsyncpa [#allocation3], 0  ;;  %s1467_s0 = inlined_call_operand.hbm [shape: f32[2,1024], index: 0, kind: input, shape index: {}]   ;;  %s1468_s1 = inlined_call_operand.hbm [shape: bf16[1024,128], index: 1, kind: input, shape index: {}]   ;;  %s1469_s2 = inlined_call_operand.vmem [shape: f32[1,128], index: 2, kind: input, shape index: {}]   ;;  %s1470_s3 = inlined_call_operand.hbm [shape: bf16[128,128], index: 3, kind: input, shape index: {}]   ;;  %s1471_s4 = inlined_call_operand.vmem [shape: f32[1,128], index: 4, kind: input, shape index: {}]   ;;  %s1472_s5 = inlined_call_operand.hbm [shape: f32[8,128], index: 5, kind: output, shape index: {}]  }
   0x1   :  { %11 = vsyncpa [#allocation6], 0 }
   0x2   :  { %12 = vsyncpa [#allocation4], 0 }
   0x3   :  { %17 = vsyncadd [#allocation3], 768  ;;  %s1356_s18 = smov [#allocation5]   ;;  %s1262_s22 = scalar_lea.hbm %s1468_s1, 8192 }
   0x4   :  { %s30_s19 = sshll.u32 %s1356_s18, 4  ;;  %p1263_p0 = scmp.ne.s32.totalorder %s1468_s1, %s1262_s22  ;;  %s31_s19 = int_to_ptr.vmem [resolvable:$true] %s30_s19 }
   0x5   :  { %p1266_p1 = scmp.lt.u32.totalorder %s1262_s22, %s1468_s1 }
   0x7   :  { %p1268_p2 = pnand %p1266_p1, %p1263_p0 }
   0x9   :  { %1271 = shalt.err (!%p1268_p2)
}
   0xa   :  { %s1272_s27 = scalar_lea.vmem %s31_s19, 8192  ;;  %p1277_p4 = scmp.lt.s32.totalorder %s31_s19, %s31_s19 }
   0xb   :  { %p1273_p3 = scmp.ne.s32.totalorder %s31_s19, %s1272_s27  ;;  %p1278_p5 = scmp.lt.s32.totalorder %s1272_s27, %s1272_s27 }
   0xd   :  { %p1279_p6 = por %p1278_p5, %p1277_p4 }
   0xf   :  { %p1280_p7 = pnand %p1279_p6, %p1273_p3 }
  0x11   :  { %1283 = shalt.err (!%p1280_p7)
}
  0x12   :  { %s1357_s28 = smov 64   ;;  %s1358_s29 = smov 4  }
  0x13   :  { %36 = dma.hbm_to_vmem [thread:$0]  %s1468_s1, 8192, %s31_s19, [#allocation6], %s1357_s28, %s1357_s28, %s1358_s29  }
  0x14   :  { %s1359_s7 = smov [#allocation2]   ;;  %s1284_s11 = scalar_lea.hbm %s1467_s0, 256 }
  0x15   :  { %s18_s8 = sshll.u32 %s1359_s7, 4  ;;  %p1285_p8 = scmp.ne.s32.totalorder %s1467_s0, %s1284_s11  ;;  %s19_s8 = int_to_ptr.vmem [resolvable:$true] %s18_s8 }
  0x16   :  { %p1288_p9 = scmp.lt.u32.totalorder %s1284_s11, %s1467_s0 }
  0x18   :  { %p1290_p10 = pnand %p1288_p9, %p1285_p8 }
  0x1a   :  { %1293 = shalt.err (!%p1290_p10)
}
  0x1b   :  { %s1294_s16 = scalar_lea.vmem %s19_s8, 256  ;;  %s1298_s1 = scalar_lea.vmem %s19_s8, 1024 }
  0x1c   :  { %p1295_p11 = scmp.ne.s32.totalorder %s19_s8, %s1294_s16  ;;  %p1299_p12 = scmp.lt.s32.totalorder %s19_s8, %s19_s8 }
  0x1d   :  { %p1300_p13 = scmp.lt.s32.totalorder %s1298_s1, %s1294_s16 }
  0x1f   :  { %p1301_p0 = por %p1300_p13, %p1299_p12 }
  0x21   :  { %p1302_p1 = pnand %p1301_p0, %p1295_p11 }
  0x23   :  { %1305 = shalt.err (!%p1302_p1)
}
  0x24   :  { %s1360_s17 = smov 256   ;;  %s1361_s18 = smov 16  }
  0x25   :  { %24 = dma.hbm_to_vmem [thread:$0]  %s1467_s0, 256, %s19_s8, [#allocation3], %s1360_s17, %s1360_s17, %s1361_s18  }
  0x26   :  { %s1362_s21 = smov [#allocation7]   ;;  %s1306_s25 = scalar_lea.hbm %s1470_s3, 1024 }
  0x27   :  { %s44_s22 = sshll.u32 %s1362_s21, 4  ;;  %p1307_p2 = scmp.ne.s32.totalorder %s1470_s3, %s1306_s25  ;;  %s45_s22 = int_to_ptr.vmem [resolvable:$true] %s44_s22 }
  0x28   :  { %p1310_p3 = scmp.lt.u32.totalorder %s1306_s25, %s1470_s3 }
  0x2a   :  { %p1312_p4 = pnand %p1310_p3, %p1307_p2 }
  0x2c   :  { %1315 = shalt.err (!%p1312_p4)
}
  0x2d   :  { %s1316_s7 = scalar_lea.vmem %s45_s22, 1024  ;;  %p1321_p6 = scmp.lt.s32.totalorder %s45_s22, %s45_s22 }
  0x2e   :  { %p1317_p5 = scmp.ne.s32.totalorder %s45_s22, %s1316_s7  ;;  %p1322_p7 = scmp.lt.s32.totalorder %s1316_s7, %s1316_s7 }
  0x30   :  { %p1323_p8 = por %p1322_p7, %p1321_p6 }
  0x32   :  { %p1324_p9 = pnand %p1323_p8, %p1317_p5 }
  0x34   :  { %1327 = shalt.err (!%p1324_p9)
}
  0x35   :  { %50 = dma.hbm_to_vmem [thread:$0]  %s1470_s3, 1024, %s45_s22, [#allocation6], %s1357_s28, %s1357_s28, %s1358_s29  }
  0x36   :  { %1350 = dma.done.wait [#allocation3], 1024  }
  0x37   :  { %1351 = vsyncadd [#allocation3], 4294966272 }
  0x38   :  { %1352 = dma.done.wait [#allocation6], 9216  }
  0x39   :  { %1353 = vsyncadd [#allocation6], 4294958080  ;;  %v1178_v0 = vld [vmem:[#allocation5 + $0x40] sm:$0xff]   ;;  %v1182_v4 = vld [vmem:[#allocation5 + $0x48] sm:$0xff]   ;;  %v1363_v24 = vmov 1983009808   ;;  %v86_v26 = vlaneseq }
  0x3a   :  { %v1179_v1 = vld [vmem:[#allocation5 + $0xc0] sm:$0xff]   ;;  %1050 = vmatprep.subr.bf16.mxu0 %v1178_v0  ;;  %v1183_v5 = vld [vmem:[#allocation5 + $0xc8] sm:$0xff]   ;;  %v1186_v8 = vld [vmem:[#allocation5 + $0x50] sm:$0xff]   ;;  %v84_v25 = vunpack.c.l.s4 %v1363_v24  ;;  %vm1365_vm0 = vmmov 0   ;;  %s1366_s9 = smov [#allocation8]  }
  0x3b   :  { %v1180_v2 = vld [vmem:[#allocation5] sm:$0xff]   ;;  %1072 = vmatprep.subr.bf16.mxu1 %v1179_v1  ;;  %v1184_v6 = vld [vmem:[#allocation5 + $0x8] sm:$0xff]   ;;  %v1187_v9 = vld [vmem:[#allocation5 + $0xd0] sm:$0xff]   ;;  %v87_v32 = vshrl.u32 %v86_v26, 7  ;;  %s966_s10 = sshll.u32 %s1366_s9, 4  ;;  %s967_s10 = int_to_ptr.vmem [resolvable:$true] %s966_s10 }
  0x3c   :  { %v1181_v3 = vld [vmem:[#allocation5 + $0x80] sm:$0xff]   ;;  %1051 = vmatpush3.bf16.msra.mxu0 %v1180_v2  ;;  %v1185_v7 = vld [vmem:[#allocation5 + $0x88] sm:$0xff]   ;;  %v1188_v10 = vld [vmem:[#allocation5 + $0x10] sm:$0xff]   ;;  %v85_v31 = vunpack.c.0.s8 %v84_v25  ;;  %s1328_s11 = scalar_lea.vmem %s967_s10, 128  ;;  %p1333_p11 = scmp.lt.s32.totalorder %s967_s10, %s967_s10 }
  0x3d   :  { %1073 = vmatpush3.bf16.msra.mxu1 %v1181_v3  ;;  %1052 = vmatprep.subr.bf16.mxu0 %v1182_v4  ;;  %v1189_v11 = vld [vmem:[#allocation5 + $0x90] sm:$0xff]   ;;  %v1190_v12 = vld [vmem:[#allocation5 + $0x58] sm:$0xff]   ;;  %v1194_v16 = vld [vmem:[#allocation5 + $0x60] sm:$0xff]   ;;  %p1329_p10 = scmp.ne.s32.totalorder %s967_s10, %s1328_s11  ;;  %p1334_p12 = scmp.lt.s32.totalorder %s1328_s11, %s1328_s11 }
  0x3e   :  { %1074 = vmatprep.subr.bf16.mxu1 %v1183_v5  ;;  %v1191_v13 = vld [vmem:[#allocation5 + $0xd8] sm:$0xff]   ;;  %v1195_v17 = vld [vmem:[#allocation5 + $0xe0] sm:$0xff]   ;;  %v1198_v20 = vld [vmem:[#allocation5 + $0x68] sm:$0xff]   ;;  %v1439_v37 = vsub.s32 %v85_v31, %v87_v32 }
  0x3f   :  { %v1192_v14 = vld [vmem:[#allocation5 + $0x18] sm:$0xff]   ;;  %v1196_v18 = vld [vmem:[#allocation5 + $0x20] sm:$0xff]   ;;  %v1199_v21 = vld [vmem:[#allocation5 + $0xe8] sm:$0xff]   ;;  %p1335_p13 = por %p1334_p12, %p1333_p11 }
  0x40   :  { %1053 = vmatpush3.bf16.msra.mxu0 %v1184_v6  ;;  %v1193_v15 = vld [vmem:[#allocation5 + $0x98] sm:$0xff]   ;;  %v1197_v19 = vld [vmem:[#allocation5 + $0xa0] sm:$0xff]   ;;  %v1200_v22 = vld [vmem:[#allocation5 + $0x28] sm:$0xff]  }
  0x41   :  { %1075 = vmatpush3.bf16.msra.mxu1 %v1185_v7  ;;  %1054 = vmatprep.subr.bf16.mxu0 %v1186_v8  ;;  %v1201_v23 = vld [vmem:[#allocation5 + $0xa8] sm:$0xff]   ;;  %v1202_v27 = vld [vmem:[#allocation5 + $0x70] sm:$0xff]   ;;  %v1206_v33 = vld [vmem:[#allocation5 + $0x78] sm:$0xff]   ;;  %p1336_p0 = pnand %p1335_p13, %p1329_p10 }
  0x42   :  { %1076 = vmatprep.subr.bf16.mxu1 %v1187_v9  ;;  %v1203_v28 = vld [vmem:[#allocation5 + $0xf0] sm:$0xff]   ;;  %v1207_v34 = vld [vmem:[#allocation5 + $0xf8] sm:$0xff]   ;;  %v1216_v44 = vld [vmem:[#allocation5 + $0x140] sm:$0xff]  }
  0x43   :  { %v1204_v29 = vld [vmem:[#allocation5 + $0x30] sm:$0xff]   ;;  %v1208_v35 = vld [vmem:[#allocation5 + $0x38] sm:$0xff]   ;;  %v1217_v47 = vld [vmem:[#allocation5 + $0x1c0] sm:$0xff]  }
  0x44   :  { %1055 = vmatpush3.bf16.msra.mxu0 %v1188_v10  ;;  %v1205_v30 = vld [vmem:[#allocation5 + $0xb0] sm:$0xff]   ;;  %v1209_v36 = vld [vmem:[#allocation5 + $0xb8] sm:$0xff]   ;;  %v1218_v50 = vld [vmem:[#allocation5 + $0x100] sm:$0xff]  }
  0x45   :  { %1077 = vmatpush3.bf16.msra.mxu1 %v1189_v11  ;;  %1056 = vmatprep.subr.bf16.mxu0 %v1190_v12  ;;  %v1210_v38 = vld [vmem:[#allocation2] ss:$16 sps:$4 sm:$0xff]   ;;  %v1214_v40 = vld [vmem:[#allocation2 + $0x4] ss:$16 sps:$4 sm:$0xff]   ;;  %v1220_v56 = vld [vmem:[#allocation5 + $0x148] sm:$0xff]  }
  0x46   :  { %1078 = vmatprep.subr.bf16.mxu1 %v1191_v13  ;;  %v1212_v39 = vld [vmem:[#allocation2 + $0x20] ss:$16 sps:$4 sm:$0xff]   ;;  %v1215_v41 = vld [vmem:[#allocation2 + $0x24] ss:$16 sps:$4 sm:$0xff]   ;;  %v89_v42 = vrot.slane %v1210_v38, %v1439_v37  ;;  %v96_v45 = vrot.slane %v1214_v40, %v1439_v37  ;;  %v1221_v59 = vld [vmem:[#allocation5 + $0x1c8] sm:$0xff]   ;;  %v1364_v40 = vmov 0.0  }
  0x47   :  { %v103_v43 = vrot.slane %v1212_v39, %v1439_v37  ;;  %v110_v46 = vrot.slane %v1215_v41, %v1439_v37  ;;  %v1219_v53 = vld [vmem:[#allocation5 + $0x180] sm:$0xff]   ;;  %v1222_v60 = vld [vmem:[#allocation5 + $0x108] sm:$0xff]   ;;  %v1224_v62 = vld [vmem:[#allocation5 + $0x150] sm:$0xff]  }
  0x48   :  { %1057 = vmatpush3.bf16.msra.mxu0 %v1192_v14  ;;  %v1223_v61 = vld [vmem:[#allocation5 + $0x188] sm:$0xff]   ;;  %v1225_v63 = vld [vmem:[#allocation5 + $0x1d0] sm:$0xff]   ;;  %v1228_v2 = vld [vmem:[#allocation5 + $0x158] sm:$0xff]  }
  0x49   :  { %1079 = vmatpush3.bf16.msra.mxu1 %v1193_v15  ;;  %1058 = vmatprep.subr.bf16.mxu0 %v1194_v16  ;;  %v112_v48 = vcombine.high %v89_v42, %v103_v43  ;;  %v111_v49 = vcombine.low %v89_v42, %v103_v43  ;;  %v114_v51 = vcombine.high %v96_v45, %v110_v46  ;;  %v1226_v0 = vld [vmem:[#allocation5 + $0x110] sm:$0xff]   ;;  %v1229_v3 = vld [vmem:[#allocation5 + $0x1d8] sm:$0xff]   ;;  %v1232_v6 = vld [vmem:[#allocation5 + $0x160] sm:$0xff]  }
  0x4a   :  { %1080 = vmatprep.subr.bf16.mxu1 %v1195_v17  ;;  %v113_v52 = vcombine.low %v96_v45, %v110_v46  ;;  %v1227_v1 = vld [vmem:[#allocation5 + $0x190] sm:$0xff]   ;;  %v1230_v4 = vld [vmem:[#allocation5 + $0x118] sm:$0xff]   ;;  %v1233_v7 = vld [vmem:[#allocation5 + $0x1e0] sm:$0xff]  }
  0x4b   :  { %v160_v54 = vpack.c.bf16 %v112_v48, %v112_v48  ;;  %v159_v55 = vpack.c.bf16 %v111_v49, %v111_v49  ;;  %v162_v57 = vpack.c.bf16 %v114_v51, %v114_v51  ;;  %v1231_v5 = vld [vmem:[#allocation5 + $0x198] sm:$0xff]   ;;  %v1234_v8 = vld [vmem:[#allocation5 + $0x120] sm:$0xff]   ;;  %v1236_v10 = vld [vmem:[#allocation5 + $0x168] sm:$0xff]  }
  0x4c   :  { %1059 = vmatpush3.bf16.msra.mxu0 %v1196_v18  ;;  %v161_v58 = vpack.c.bf16 %v113_v52, %v113_v52  ;;  %v1235_v9 = vld [vmem:[#allocation5 + $0x1a0] sm:$0xff]   ;;  %v1237_v11 = vld [vmem:[#allocation5 + $0x1e8] sm:$0xff]   ;;  %v1240_v14 = vld [vmem:[#allocation5 + $0x170] sm:$0xff]  }
  0x4d   :  { %1081 = vmatpush3.bf16.msra.mxu1 %v1197_v19  ;;  %1060 = vmatprep.subr.bf16.mxu0 %v1198_v20  ;;  %v1238_v12 = vld [vmem:[#allocation5 + $0x128] sm:$0xff]   ;;  %v1241_v15 = vld [vmem:[#allocation5 + $0x1f0] sm:$0xff]   ;;  %v1244_v18 = vld [vmem:[#allocation5 + $0x178] sm:$0xff]  }
  0x4e   :  { %1082 = vmatprep.subr.bf16.mxu1 %v1199_v21  ;;  %718 = vmatprep.mubr.bf16.mxu0 %v160_v54  ;;  %v1239_v13 = vld [vmem:[#allocation5 + $0x1a8] sm:$0xff]   ;;  %v1242_v16 = vld [vmem:[#allocation5 + $0x130] sm:$0xff]   ;;  %v1245_v19 = vld [vmem:[#allocation5 + $0x1f8] sm:$0xff]  }
  0x4f   :  { %758 = vmatprep.mubr.bf16.mxu1 %v162_v57  ;;  %v1243_v17 = vld [vmem:[#allocation5 + $0x1b0] sm:$0xff]   ;;  %v1246_v20 = vld [vmem:[#allocation5 + $0x138] sm:$0xff]   ;;  %v1254_v39 = vld [vmem:[#allocation7] sm:$0xff]  }
  0x50   :  { %1061 = vmatpush3.bf16.msra.mxu0 %v1200_v22  ;;  %v1247_v21 = vld [vmem:[#allocation5 + $0x1b8] sm:$0xff]   ;;  %v1255_v41 = vld [vmem:[#allocation7 + $0x8] sm:$0xff]   ;;  %v1258_v43 = vld [vmem:[#allocation7 + $0x20] sm:$0xff]  }
  0x51   :  { %1083 = vmatpush3.bf16.msra.mxu1 %v1201_v23  ;;  %1062 = vmatprep.subr.bf16.mxu0 %v1202_v27  ;;  %v1248_v22 = vld [vmem:[#allocation2 + $0x8] ss:$16 sps:$4 sm:$0xff]   ;;  %v1252_v24 = vld [vmem:[#allocation2 + $0xc] ss:$16 sps:$4 sm:$0xff]   ;;  %v1260_v45 = vld [vmem:[#allocation7 + $0x30] sm:$0xff]  }
  0x52   :  { %1084 = vmatprep.subr.bf16.mxu1 %v1203_v28  ;;  %v1250_v23 = vld [vmem:[#allocation2 + $0x28] ss:$16 sps:$4 sm:$0xff]   ;;  %v1253_v25 = vld [vmem:[#allocation2 + $0x2c] ss:$16 sps:$4 sm:$0xff]   ;;  %v125_v26 = vrot.slane %v1248_v22, %v1439_v37  ;;  %v132_v28 = vrot.slane %v1252_v24, %v1439_v37  ;;  %v976_v49 = vld [vmem:[%s1469_s2] ss:$0 sm:$0xff] }
  0x53   :  { %v139_v27 = vrot.slane %v1250_v23, %v1439_v37  ;;  %v1257_v42 = vld [vmem:[#allocation7 + $0x18] sm:$0xff]  }
  0x54   :  { %1063 = vmatpush3.bf16.msra.mxu0 %v1204_v29  ;;  %v146_v29 = vrot.slane %v1253_v25, %v1439_v37  ;;  %v1256_v37 = vld [vmem:[#allocation7 + $0x10] sm:$0xff]   ;;  %v1261_v46 = vld [vmem:[#allocation7 + $0x38] sm:$0xff]  }
  0x55   :  { %1085 = vmatpush3.bf16.msra.mxu1 %v1205_v30  ;;  %1064 = vmatprep.subr.bf16.mxu0 %v1206_v33  ;;  %v148_v30 = vcombine.high %v125_v26, %v139_v27  ;;  %v147_v31 = vcombine.low %v125_v26, %v139_v27 }
  0x56   :  { %1086 = vmatprep.subr.bf16.mxu1 %v1207_v34  ;;  %v150_v32 = vcombine.high %v132_v28, %v146_v29  ;;  %v149_v33 = vcombine.low %v132_v28, %v146_v29 }
  0x57   :  { %v164_v34 = vpack.c.bf16 %v148_v30, %v148_v30 }
  0x58   :  { %1065 = vmatpush3.bf16.msra.mxu0 %v1208_v35  ;;  %v163_v35 = vpack.c.bf16 %v147_v31, %v147_v31  ;;  %v165_v38 = vpack.c.bf16 %v149_v33, %v149_v33 }
  0x59   :  { %1087 = vmatpush3.bf16.msra.mxu1 %v1209_v36  ;;  %1094 = vmatprep.subr.bf16.mxu0 %v1216_v44  ;;  %v166_v36 = vpack.c.bf16 %v150_v32, %v150_v32  ;;  %v1259_v44 = vld [vmem:[#allocation7 + $0x28] sm:$0xff]  }
  0x5a   :  { %1116 = vmatprep.subr.bf16.mxu1 %v1217_v47 }
  0x5b   :  { %719 = vmatmul.mubr.bf16.vlgmr.msra.gmra.mrb[0].mxu0 %v159_v55 }
  0x5c   :  { %759 = vmatmul.mubr.bf16.vlgmr.msra.gmra.mrb[0].mxu1 %v161_v58  ;;  %1095 = vmatpush3.bf16.msra.mxu0 %v1218_v50 }
  0x5d   :  { %1117 = vmatpush3.bf16.msra.mxu1 %v1219_v53  ;;  %1096 = vmatprep.subr.bf16.mxu0 %v1220_v56 }
  0x5e   :  { %1118 = vmatprep.subr.bf16.mxu1 %v1221_v59  ;;  %798 = vmatprep.mubr.bf16.mxu0 %v164_v34 }
  0x5f   :  { %838 = vmatprep.mubr.bf16.mxu1 %v166_v36 }
  0x60   :  { %1097 = vmatpush3.bf16.msra.mxu0 %v1222_v60 }
  0x61   :  { %1119 = vmatpush3.bf16.msra.mxu1 %v1223_v61  ;;  %1098 = vmatprep.subr.bf16.mxu0 %v1224_v62 }
  0x62   :  { %1120 = vmatprep.subr.bf16.mxu1 %v1225_v63 }
  0x64   :  { %1099 = vmatpush3.bf16.msra.mxu0 %v1226_v0 }
  0x65   :  { %1121 = vmatpush3.bf16.msra.mxu1 %v1227_v1  ;;  %1100 = vmatprep.subr.bf16.mxu0 %v1228_v2 }
  0x66   :  { %1122 = vmatprep.subr.bf16.mxu1 %v1229_v3 }
  0x68   :  { %1101 = vmatpush3.bf16.msra.mxu0 %v1230_v4 }
  0x69   :  { %1123 = vmatpush3.bf16.msra.mxu1 %v1231_v5  ;;  %1102 = vmatprep.subr.bf16.mxu0 %v1232_v6 }
  0x6a   :  { %1124 = vmatprep.subr.bf16.mxu1 %v1233_v7 }
  0x6c   :  { %1103 = vmatpush3.bf16.msra.mxu0 %v1234_v8 }
  0x6d   :  { %1125 = vmatpush3.bf16.msra.mxu1 %v1235_v9  ;;  %1104 = vmatprep.subr.bf16.mxu0 %v1236_v10  ;;  %v1041_v10 = vld [vmem:[%s1471_s4] ss:$0 sm:$0xff] }
  0x6e   :  { %1126 = vmatprep.subr.bf16.mxu1 %v1237_v11 }
  0x70   :  { %1105 = vmatpush3.bf16.msra.mxu0 %v1238_v12 }
  0x71   :  { %1127 = vmatpush3.bf16.msra.mxu1 %v1239_v13  ;;  %1106 = vmatprep.subr.bf16.mxu0 %v1240_v14 }
  0x72   :  { %1128 = vmatprep.subr.bf16.mxu1 %v1241_v15 }
  0x74   :  { %1107 = vmatpush3.bf16.msra.mxu0 %v1242_v16 }
  0x75   :  { %1129 = vmatpush3.bf16.msra.mxu1 %v1243_v17  ;;  %1108 = vmatprep.subr.bf16.mxu0 %v1244_v18 }
  0x76   :  { %1130 = vmatprep.subr.bf16.mxu1 %v1245_v19 }
  0x78   :  { %1109 = vmatpush3.bf16.msra.mxu0 %v1246_v20 }
  0x79   :  { %1131 = vmatpush3.bf16.msra.mxu1 %v1247_v21  ;;  %1147 = vmatprep.subr.bf16.mxu0 %v1364_v40 }
  0x7b   :  { %799 = vmatmul.mubr.bf16.vlgmr.msra.gmra.mrb[4].mxu0 %v163_v35 }
  0x7c   :  { %839 = vmatmul.mubr.bf16.vlgmr.msra.gmra.mrb[4].mxu1 %v165_v38  ;;  %1148 = vmatpush3.bf16.msra.mxu0 %v1254_v39 }
  0x7d   :  { %1149 = vmatprep.subr.bf16.mxu0 %v1364_v40  ;;  %1163 = vmatprep.mubr.msk.bf16.mxu0 %vm1365_vm0, %v1364_v40 }
  0x80   :  { %1150 = vmatpush3.bf16.msra.mxu0 %v1255_v41 }
  0x81   :  { %1151 = vmatprep.subr.bf16.mxu0 %v1364_v40 }
  0x84   :  { %1152 = vmatpush3.bf16.msra.mxu0 %v1256_v37 }
  0x85   :  { %1153 = vmatprep.subr.bf16.mxu0 %v1364_v40 }
  0x88   :  { %1154 = vmatpush3.bf16.msra.mxu0 %v1257_v42 }
  0x89   :  { %1155 = vmatprep.subr.bf16.mxu0 %v1364_v40 }
  0x8c   :  { %1156 = vmatpush3.bf16.msra.mxu0 %v1258_v43 }
  0x8d   :  { %1157 = vmatprep.subr.bf16.mxu0 %v1364_v40 }
  0x90   :  { %1158 = vmatpush3.bf16.msra.mxu0 %v1259_v44 }
  0x91   :  { %1159 = vmatprep.subr.bf16.mxu0 %v1364_v40 }
  0x94   :  { %1160 = vmatpush3.bf16.msra.mxu0 %v1260_v45 }
  0x95   :  { %1161 = vmatprep.subr.bf16.mxu0 %v1364_v40 }
  0x98   :  { %1162 = vmatpush3.bf16.msra.mxu0 %v1261_v46 }
 0x12e   :  { %v1066_v47 = vpop.f32.mrb[0].mxu0 }
 0x12f   :  { %v1088_v48 = vpop.f32.mrb[0].mxu1  ;;  %v1067_v50 = vpop.f32.mrb[1].mxu0 }
 0x130   :  { %v1068_v51 = vadd.f32 %v1067_v50, %v1066_v47  ;;  %v1089_v52 = vpop.f32.mrb[1].mxu1  ;;  %v1069_v53 = vpop.f32.mrb[2].mxu0 }
 0x131   :  { %v1090_v54 = vadd.f32 %v1089_v52, %v1088_v48  ;;  %v1091_v55 = vpop.f32.mrb[2].mxu1  ;;  %v1070_v56 = vpop.f32.mrb[3].mxu0 }
 0x132   :  { %v721_v57 = vadd.f32 %v1068_v51, %v976_v49  ;;  %v1092_v58 = vpop.f32.mrb[3].mxu1 }
 0x134   :  { %v761_v59 = vadd.f32 %v1090_v54, %v721_v57 }
 0x14e   :  { %v1110_v60 = vpop.f32.mrb[4].mxu0 }
 0x14f   :  { %v1132_v61 = vpop.f32.mrb[4].mxu1  ;;  %v1111_v62 = vpop.f32.mrb[5].mxu0 }
 0x150   :  { %v1112_v63 = vadd.f32 %v1111_v62, %v1110_v60  ;;  %v1133_v0 = vpop.f32.mrb[5].mxu1  ;;  %v1113_v1 = vpop.f32.mrb[6].mxu0 }
 0x151   :  { %v1134_v2 = vadd.f32 %v1133_v0, %v1132_v61  ;;  %v1135_v3 = vpop.f32.mrb[6].mxu1  ;;  %v1114_v4 = vpop.f32.mrb[7].mxu0 }
 0x152   :  { %v801_v5 = vadd.f32 %v1112_v63, %v761_v59  ;;  %v1136_v6 = vpop.f32.mrb[7].mxu1 }
 0x154   :  { %v841_v7 = vadd.f32 %v1134_v2, %v801_v5 }
 0x156   :  { %v846_v8 = vmax.f32 %v841_v7, 0.0 }
 0x158   :  { %v847_v9 = vpack.c.bf16 %v846_v8, %v846_v8 }
 0x15a   :  { %1164 = vmatmul.mubr.bf16.vlgmr.msra.gmra.mrb[8].mxu0 %v847_v9 }
 0x22d   :  { %v953_v11 = vpop.f32.mrb[8].mxu0 }
 0x22e   :  { %v954_v12 = vadd.f32 %v1041_v10, %v953_v11  ;;  %v1165_v13 = vpop.f32.mrb[9].mxu0 }
 0x22f   :  { %v956_v14 = vpop.f32.mrb[10].mxu0 }
 0x230   :  { %959 = vst [vmem:[#allocation8] sm:$0xff] %v954_v12  ;;  %v1166_v15 = vpop.f32.mrb[11].mxu0 }
 0x231   :  { %1339 = shalt.err (!%p1336_p0)
}
 0x232   :  { %s1340_s4 = scalar_lea.hbm %s1472_s5, 128 }
 0x233   :  { %p1341_p1 = scmp.ne.s32.totalorder %s1472_s5, %s1340_s4  ;;  %p1344_p2 = scmp.lt.u32.totalorder %s1340_s4, %s1472_s5 }
 0x235   :  { %p1346_p3 = pnand %p1344_p2, %p1341_p1 }
 0x237   :  { %1349 = shalt.err (!%p1346_p3)
}
 0x238   :  { %969 = dma.vmem_to_hbm [thread:$0]  %s967_s10, 128, %s1472_s5, [#allocation4]  }
 0x239   :  { %1354 = dma.done.wait [#allocation4], 128  }
 0x23a   :  { %1355 = vsyncadd [#allocation4], 4294967168 }
 0x23b   :  { %973 = vsyncpa [#allocation3], 1 }
 0x23c   :  { %974 = vsyncpa [#allocation6], 1 }
 0x23d   :  { %975 = vsyncpa [#allocation4], 1 }

</bundles_post_ra>
